<compile_context>
chip_gen: v5e
topology: v5e:2x2
jax: 0.10.0
libtpu: 0.0.40
codegen_flags: <defaults>
</compile_context>

<pallas_src>
import math
from functools import partial

import numpy as np
import jax
import jax.numpy as jnp
from jax.experimental import pallas as pl
from jax.experimental.pallas import tpu as pltpu


# ------------------------------------------------------------------
# Configuration (mirrors _IcoConv.__init__ for the chosen instantiation)
# ------------------------------------------------------------------
IN_FEATURES = 4
OUT_FEATURES = 8
IN_SUBDIV = 2
OUT_SUBDIV = 2
IN_DEPTH = 1
OUT_DEPTH = 1
KERNEL_SIZE = 3
CORNER_MODE = "zeros"
USE_BIAS = True

IN_CHANNELS = IN_FEATURES * IN_DEPTH            # 4
OUT_CHANNELS = OUT_FEATURES * OUT_DEPTH         # 8
STRIDE = 1                                      # in_subdiv == out_subdiv
BASE_H_IN = 2 ** IN_SUBDIV                      # 4
HEIGHT_IN = BASE_H_IN * 5                       # 20
WIDTH_IN = BASE_H_IN * 2                        # 8
P_BASE_H_IN = BASE_H_IN + 2                     # 6
P_HEIGHT_IN = P_BASE_H_IN * 5                   # 30
P_WIDTH_IN = WIDTH_IN + 2                       # 10
P_WIDTH_HALF_IN = P_WIDTH_IN // 2               # 5
BASE_H_OUT = BASE_H_IN // STRIDE                # 4
HEIGHT_OUT = BASE_H_OUT * 5                     # 20
WIDTH_OUT = WIDTH_IN // STRIDE                  # 8
WEIGHTS_PER_FILTER = 7
K_TOTAL = IN_CHANNELS * 9                       # 36
K_PAD = 40                                      # 36 taps + 1 bias/mask row + 3 zero rows
M_IMG = HEIGHT_OUT * WIDTH_OUT                  # 160 output pixels per image
LANE = 128


# ------------------------------------------------------------------
# Index buffers (faithful port of _IcoBase / _IcoConv setup for this config)
# ------------------------------------------------------------------
def build_indices():
    pad_long = BASE_H_IN
    pad_short = pad_long - 1
    pad_var = pad_short if CORNER_MODE == "zeros" else pad_long
    prev_map2 = [4, 0, 1, 2, 3]
    next_map2 = [1, 2, 3, 4, 0]

    sx, sy, tx, ty = [], [], [], []
    usx, usy, utx, uty = [], [], [], []     # "ch_up" lists (depth==1 -> same channel)
    dsx, dsy, dtx, dty = [], [], [], []     # "ch_down" lists

    for i in range(5):
        uty += [i * P_BASE_H_IN] * pad_var
        utx += list(range(2, 2 + pad_var))
        usy += list(range(prev_map2[i] * BASE_H_IN, prev_map2[i] * BASE_H_IN + pad_var))
        usx += [0] * pad_var

        uty += [(i + 1) * P_BASE_H_IN - 1] * pad_long
        utx += list(range(P_WIDTH_HALF_IN, P_WIDTH_HALF_IN + pad_long))
        usy += list(range(next_map2[i] * BASE_H_IN, next_map2[i] * BASE_H_IN + pad_long))
        usx += [-1] * pad_long

        dty += list(range(i * P_BASE_H_IN + 1, i * P_BASE_H_IN + 1 + pad_short))
        dtx += [-1] * pad_short
        dsy += [(prev_map2[i] + 1) * BASE_H_IN - 1] * pad_short
        dsx += list(range(BASE_H_IN + 1, BASE_H_IN + 1 + pad_short))

        dty += list(range(i * P_BASE_H_IN + 1, i * P_BASE_H_IN + 1 + pad_long))
        dtx += [0] * pad_long
        dsy += [next_map2[i] * BASE_H_IN] * pad_long
        dsx += list(range(0, pad_long))

        ty += [i * P_BASE_H_IN] * pad_var
        tx += list(range(P_WIDTH_HALF_IN + 1, P_WIDTH_HALF_IN + 1 + pad_var))
        sy += [(prev_map2[i] + 1) * BASE_H_IN - 1] * pad_var
        sx += list(range(1, 1 + pad_var))

        ty += [(i + 1) * P_BASE_H_IN - 1] * pad_long
        tx += list(range(1, 1 + pad_long))
        sy += [next_map2[i] * BASE_H_IN] * pad_long
        sx += list(range(BASE_H_IN, BASE_H_IN + pad_long))

    # in_feature_depth != 6 -> ch_up / ch_down lists are merged into the main lists
    ty = np.array(ty + uty + dty)
    tx = np.array(tx + utx + dtx)
    sy = np.array(sy + usy + dsy)
    sx = np.array(sx + usx + dsx)
    tx = tx % P_WIDTH_IN
    sx = sx % WIDTH_IN

    row_target = (np.arange(1, P_BASE_H_IN - 1)[None, :]
                  + np.arange(0, P_BASE_H_IN * 5, P_BASE_H_IN)[:, None]).flatten()

    # corner_mode == 'zeros'
    pcorner_x = np.array([1, P_WIDTH_HALF_IN])
    pcorner_y = np.arange(1, 6)[:, None] * P_BASE_H_IN - 2

    corner_target_y = np.tile((np.arange(1, 6)[:, None] * BASE_H_OUT - 1), (2, 1))
    corner_target_x = np.array([0] * 5 + [BASE_H_OUT] * 5)[:, None]

    # kernel_size == 3, stride == 1
    conv_base_h_out = P_BASE_H_IN // STRIDE
    inner_pad_after_conv = 2 // STRIDE
    row_off = 1 if STRIDE == 2 else 0
    strided_row_src = (np.arange(conv_base_h_out - inner_pad_after_conv)[None, :]
                       + np.arange(0, conv_base_h_out * 5, conv_base_h_out)[:, None]
                       ).flatten() + row_off

    # filter-expansion indices (in_depth=1, out_depth=1, kernel=3 branch)
    expanded_weight_indices = np.arange(OUT_FEATURES * IN_CHANNELS * WEIGHTS_PER_FILTER
                                        ).reshape(OUT_FEATURES, IN_CHANNELS, WEIGHTS_PER_FILTER)

    return dict(tgt_y=ty, tgt_x=tx, src_y=sy, src_x=sx, row_target=row_target,
                pcorner_y=pcorner_y, pcorner_x=pcorner_x,
                corner_ty=corner_target_y, corner_tx=corner_target_x,
                strided_row_src=strided_row_src,
                ewi=expanded_weight_indices)


IDX = build_indices()


# ------------------------------------------------------------------
# Batch-independent gather plan (numpy, built once at import time):
# fused g_pad + im2col + row-selection + corner-zero + bias/mask row.
#   idx_img[k, m] indexes one image's flat [C*H*W (+zero)(+one)] vector.
# ------------------------------------------------------------------
ZERO_IDX = IN_CHANNELS * HEIGHT_IN * WIDTH_IN       # 640 -> 0.0
ONE_IDX = ZERO_IDX + 1                              # 641 -> 1.0


def build_gather_plan():
    # src_hw[ph, pw] = flat (sy*W + sx) index into one CHANNEL of x, or -1 -> zero.
    # Exactly replicates g_pad's write order (padding writes, inner-row copy,
    # then set_pcorners_zero).
    src_hw = np.full((P_HEIGHT_IN, P_WIDTH_IN), -1, dtype=np.int64)
    src_hw[IDX["tgt_y"], IDX["tgt_x"]] = IDX["src_y"] * WIDTH_IN + IDX["src_x"]
    inner = (np.arange(HEIGHT_IN)[:, None] * WIDTH_IN + np.arange(WIDTH_IN)[None, :])
    src_hw[IDX["row_target"][:, None], np.arange(1, P_WIDTH_IN - 1)[None, :]] = inner
    src_hw[IDX["pcorner_y"], IDX["pcorner_x"]] = -1             # set_pcorners_zero

    per_ch = HEIGHT_IN * WIDTH_IN                               # 160 elems per channel

    ci = np.arange(IN_CHANNELS).reshape(-1, 1, 1, 1, 1)
    dy = np.arange(3).reshape(1, -1, 1, 1, 1)
    dx = np.arange(3).reshape(1, 1, -1, 1, 1)
    ho = np.arange(HEIGHT_OUT).reshape(1, 1, 1, -1, 1)
    wo = np.arange(WIDTH_OUT).reshape(1, 1, 1, 1, -1)

    # Only the rows kept by strided_row_src are ever produced.
    ph = IDX["strided_row_src"][ho] + dy            # padded row of the 3x3 window
    pw = wo + dx                                    # padded col of the 3x3 window
    s = src_hw[ph, pw]                              # (1,3,3,H_out,W_out)
    idx = np.where(s >= 0, ci * per_ch + s, ZERO_IDX)           # (Cin,3,3,H_out,W_out)
    idx = idx.reshape(K_TOTAL, M_IMG)               # k = ci*9+dy*3+dx ; col = (h, w)

    # set_outcorners_zero folded into the matmul: corner columns take all their
    # conv taps from the zero sentinel, and get 0 in the bias/mask row.
    keep = np.ones((HEIGHT_OUT, WIDTH_OUT), bool)
    keep[IDX["corner_ty"], IDX["corner_tx"]] = False
    keep = keep.reshape(-1)                                     # (160,)
    idx[:, ~keep] = ZERO_IDX

    bias_row = np.where(keep, ONE_IDX, ZERO_IDX)[None, :]       # (1, 160)
    zero_rows = np.full((K_PAD - K_TOTAL - 1, M_IMG), ZERO_IDX) # pad K 37 -> 40
    return np.concatenate([idx, bias_row, zero_rows], 0).astype(np.int32)   # (40, 160)


GATHER_IDX = build_gather_plan()        # ~26 KB constant, independent of batch size


# ------------------------------------------------------------------
# Parameter setup: compose_filters (index gymnastics, plain JAX)
# ------------------------------------------------------------------
def compose_filters(weight, bias):
    # weight: [out_features, in_channels, 7] -> filters [out_channels, in_channels, 3, 3]
    taken = weight.reshape(-1)[IDX["ewi"]]                        # [OC, IC, 7]
    flat = jnp.zeros((OUT_CHANNELS, IN_CHANNELS, 9), weight.dtype)
    flat = flat.at[:, :, 1:8].set(taken)
    filters = flat.reshape(OUT_CHANNELS, IN_CHANNELS, 3, 3)
    bias_expanded = bias.reshape(-1)                              # out_feature_depth != 6
    return filters, bias_expanded


# ------------------------------------------------------------------
# Pallas kernel: one lane-dense MXU matmul.  Bias + corner-zero are already
# folded into w_aug / the gathered X, so the body is a single dot.
#   out[Cout, blk] = W_aug[Cout, 40] @ X[40, blk]
# ------------------------------------------------------------------
def _ico_matmul_kernel(w_ref, x_ref, o_ref):
    o_ref[...] = jnp.dot(w_ref[...], x_ref[...],
                         preferred_element_type=jnp.float32).astype(o_ref.dtype)


def pallas_ico_conv_mm(w_aug, patches_t, blk, num_blocks, core_parallel):
    cout, k = w_aug.shape
    m_pad = patches_t.shape[1]
    sem = (pltpu.CORE_PARALLEL if core_parallel else pltpu.PARALLEL,)
    cost = pl.CostEstimate(
        flops=2 * cout * k * m_pad,
        transcendentals=0,
        bytes_accessed=4 * (w_aug.size + patches_t.size + cout * m_pad))
    return pl.pallas_call(
        _ico_matmul_kernel,
        out_shape=jax.ShapeDtypeStruct((cout, m_pad), patches_t.dtype),
        grid_spec=pltpu.PrefetchScalarGridSpec(
            num_scalar_prefetch=0,
            grid=(num_blocks,),
            in_specs=[
                pl.BlockSpec((cout, k), lambda i: (0, 0)),
                pl.BlockSpec((k, blk), lambda i: (0, i)),
            ],
            out_specs=pl.BlockSpec((cout, blk), lambda i: (0, i)),
        ),
        compiler_params=pltpu.CompilerParams(dimension_semantics=sem),
        cost_estimate=cost,
    )(w_aug, patches_t)


# ------------------------------------------------------------------
# Size-derived tiling (replaces the device-keyed num_blocks of the previous version)
# ------------------------------------------------------------------
def plan_tiling(batch_size, device_kind=None):
    if device_kind is None:
        try:
            device_kind = jax.devices()[0].device_kind
        except Exception:
            device_kind = ""
    n_cores = 2 if "v7" in device_kind.lower() else 1   # v7x: 2 TensorCores/chip
    m_valid = batch_size * M_IMG
    m_round = -(-m_valid // LANE) * LANE
    target_blk = 2048              # 40 x 2048 x f32 ~ 0.33 MiB per X buffer (v7x-VMEM safe)
    nblk = max(1, -(-m_round // target_blk))
    min_blocks = 2 * n_cores       # >=2 pipelined grid steps per core when data allows
    if m_round >= min_blocks * LANE:
        nblk = max(nblk, min_blocks)
    per_blk = -(-m_round // nblk)
    blk = -(-per_blk // LANE) * LANE
    nblk = -(-m_round // blk)
    if n_cores > 1 and nblk % n_cores:
        nblk += n_cores - nblk % n_cores
    return blk, nblk, (n_cores > 1)


# ------------------------------------------------------------------
# Full _IcoConv forward
# ------------------------------------------------------------------
@partial(jax.jit, static_argnames=("blk", "num_blocks", "core_parallel"))
def ico_conv_forward(x, weight, bias, *, blk, num_blocks, core_parallel=False):
    B = x.shape[0]
    m_valid = B * M_IMG
    m_pad = blk * num_blocks

    filters, bias_exp = compose_filters(weight, bias)
    # Augmented weights: 36 conv taps | bias column | 3 zero columns  -> [Cout, 40]
    w_aug = jnp.concatenate(
        [filters.reshape(OUT_CHANNELS, K_TOTAL),
         bias_exp.reshape(OUT_CHANNELS, 1),
         jnp.zeros((OUT_CHANNELS, K_PAD - K_TOTAL - 1), filters.dtype)], axis=1)

    # Fused g_pad + im2col (kept rows only) + corner-zero + bias/mask row as a single
    # batch-broadcast gather using the B-independent [40, 160] index constant.
    # TODO(synk): for large B, fuse this gather into the Pallas kernel (padded image
    # resident in VMEM, taps formed with static slices) to avoid the ~10x-expanded
    # patches HBM round trip; arbitrary icosahedral gathers have no clean Mosaic
    # lowering yet, so it stays in XLA here.
    x2 = jnp.concatenate([x.reshape(B, -1),
                          jnp.zeros((B, 1), x.dtype),
                          jnp.ones((B, 1), x.dtype)], axis=1)      # [B, 642]
    patches = x2[:, jnp.asarray(GATHER_IDX)]                       # [B, 40, 160]
    patches_t = jnp.transpose(patches, (1, 0, 2)).reshape(K_PAD, m_valid)
    patches_t = jnp.pad(patches_t, ((0, 0), (0, m_pad - m_valid)))  # lane-dense [40, m_pad]

    y_lane = pallas_ico_conv_mm(w_aug, patches_t, blk, num_blocks, core_parallel)
    y = y_lane[:, :m_valid].reshape(OUT_CHANNELS, B, HEIGHT_OUT, WIDTH_OUT)
    return jnp.transpose(y, (1, 0, 2, 3))              # NCHW


# ------------------------------------------------------------------
# Pure-JAX reference (g_pad + lax.conv) for the correctness check
# ------------------------------------------------------------------
def g_pad(x):
    B, C, _, _ = x.shape
    out = jnp.zeros((B, C, P_HEIGHT_IN, P_WIDTH_IN), x.dtype)
    out = out.at[:, :, IDX["tgt_y"], IDX["tgt_x"]].set(x[:, :, IDX["src_y"], IDX["src_x"]])
    out = out.at[:, :, IDX["row_target"], 1:P_WIDTH_IN - 1].set(x)
    out = out.at[:, :, IDX["pcorner_y"], IDX["pcorner_x"]].set(0.0)
    return out


def ico_conv_reference(x, weight, bias):
    filters, bias_exp = compose_filters(weight, bias)
    xp = g_pad(x)
    y = jax.lax.conv_general_dilated(
        xp, filters, window_strides=(1, 1), padding="VALID",
        dimension_numbers=("NCHW", "OIHW", "NCHW"))
    y = y + bias_exp[None, :, None, None]
    y = y[:, :, IDX["strided_row_src"], :]
    y = y.at[:, :, IDX["corner_ty"], IDX["corner_tx"]].set(0.0)
    return y


if __name__ == "__main__":
    key = jax.random.PRNGKey(0)
    kw, kb, kx = jax.random.split(key, 3)

    # deterministic parameter init (shapes match _IcoConv: weight [OF, Cin, 7], bias [OF, 1])
    fan_in = IN_CHANNELS * WEIGHTS_PER_FILTER
    bound_w = math.sqrt(6.0 / fan_in)                   # ~ kaiming_uniform(a=sqrt(5)) scale
    weight = jax.random.uniform(kw, (OUT_FEATURES, IN_CHANNELS, WEIGHTS_PER_FILTER),
                                minval=-bound_w, maxval=bound_w, dtype=jnp.float32)
    bound_b = 1.0 / math.sqrt(fan_in)
    bias = jax.random.uniform(kb, (OUT_FEATURES, 1),
                              minval=-bound_b, maxval=bound_b, dtype=jnp.float32)

    x = jax.random.normal(kx, (2, IN_CHANNELS, HEIGHT_IN, WIDTH_IN), dtype=jnp.float32)

    blk, num_blocks, core_parallel = plan_tiling(x.shape[0])
    out = jax.block_until_ready(
        ico_conv_forward(x, weight, bias,
                         blk=blk, num_blocks=num_blocks, core_parallel=core_parallel))
    ref = jax.block_until_ready(ico_conv_reference(x, weight, bias))

    assert out.shape == (2, OUT_CHANNELS, HEIGHT_OUT, WIDTH_OUT), out.shape
    assert np.allclose(np.asarray(out), np.asarray(ref), rtol=1e-4, atol=1e-4)
    print("KERNEL_OK")
</pallas_src>

<mosaic_0001>
module attributes {stable_mosaic.version = 11 : i64} {
  func.func @_ico_matmul_kernel(%arg0: i32, %arg1: memref<8x40xf32, #tpu.memory_space<vmem>>, %arg2: memref<40x256xf32, #tpu.memory_space<vmem>>, %arg3: memref<8x256xf32, #tpu.memory_space<vmem>>) attributes {dimension_semantics = [#tpu.dimension_semantics<parallel>], iteration_bounds = array<i64: 2>, scalar_prefetch = 0 : i64, scratch_operands = 0 : i64, tpu.core_type = #tpu.core_type<tc>, window_params = [{pipeline_mode = #tpu.pipeline_mode<synchronous>, transform_indices = @transform_0, window_bounds = array<i64: 8, 40>}, {transform_indices = @transform_1, window_bounds = array<i64: 40, 256>}, {transform_indices = @transform_2, window_bounds = array<i64: 8, 256>}]} {
    %c0 = arith.constant 0 : index
    %c0_0 = arith.constant 0 : index
    %0 = vector.load %arg1[%c0, %c0_0] : memref<8x40xf32, #tpu.memory_space<vmem>>, vector<8x40xf32>
    %c0_1 = arith.constant 0 : index
    %c0_2 = arith.constant 0 : index
    %1 = vector.load %arg2[%c0_1, %c0_2] : memref<40x256xf32, #tpu.memory_space<vmem>>, vector<40x256xf32>
    %cst = arith.constant dense<0.000000e+00> : vector<8x256xf32>
    %2 = tpu.matmul %0, %1, %cst {dimension_numbers = #tpu.dot_dimension_numbers<[1], [0], [0], [1], [0, 0, 1, 1], [], []>} : vector<8x40xf32>, vector<40x256xf32>, vector<8x256xf32> -> vector<8x256xf32>
    %c0_3 = arith.constant 0 : index
    %c0_4 = arith.constant 0 : index
    %3 = vector.load %arg3[%c0_3, %c0_4] : memref<8x256xf32, #tpu.memory_space<vmem>>, vector<8x256xf32>
    tpu.vector_store %arg3[%c0_3, %c0_4], %2 {strides = array<i32>} : memref<8x256xf32, #tpu.memory_space<vmem>>, vector<8x256xf32>,
    return
  }
  func.func @transform_0(%arg0: i32) -> (i32, i32) {
    %c0_i32 = arith.constant 0 : i32
    %c0_i32_0 = arith.constant 0 : i32
    %c0_i32_1 = arith.constant 0 : i32
    return %c0_i32, %c0_i32_0 : i32, i32
  }
  func.func @transform_1(%arg0: i32) -> (i32, i32) {
    %c0_i32 = arith.constant 0 : i32
    %c0_i32_0 = arith.constant 0 : i32
    return %c0_i32, %arg0 : i32, i32
  }
  func.func @transform_2(%arg0: i32) -> (i32, i32) {
    %c0_i32 = arith.constant 0 : i32
    %c0_i32_0 = arith.constant 0 : i32
    return %c0_i32, %arg0 : i32, i32
  }
}

</mosaic_0001>

<bundles_post_ra>
// kernel: ico_conv_forward.1
= control target key start
LH: loop header
LB: loop body
LE: loop exit
PB: predicated region body
PF: predicated region fallthrough
CT: control target
= control target key end

     0   :  { %s382_s9 = smov 0   ;;  %s384_s10 = smov 0   ;;  %s437_s0 = inlined_call_operand.vmem [shape: f32[8,40], index: 0, kind: input, shape index: {}]   ;;  %s438_s1 = inlined_call_operand.vmem [shape: f32[40,512], index: 1, kind: input, shape index: {}]   ;;  %s439_s2 = inlined_call_operand.vmem [shape: f32[8,512], index: 2, kind: output, shape index: {}]  }
   0x1   :  { %s386_s11 = smov 0  }
   0x2 LB: > { %s303_s12 = sadd.s32 4294967295, %s365_s11   ;;  %s399_s13 = sadd.s32 1, %s365_s11   ;;  %s365_s11 = sphi %s386_s11, %s442_s11   ;;  %s361_s10 = sphi %s384_s10, %s441_s10   ;;  %s357_s9 = sphi %s382_s9, %s440_s9  }
   0x3   : > { %s37_s14 = ssub.s32 %s365_s11, %s399_s13  ;;  %s40_s15 = sadd.s32 1, %s361_s10 }
   0x4   : > { %p38_p0 = scmp.eq.s32.totalorder %s37_s14, 0  ;;  %p47_p1 = scmp.ne.s32.totalorder %s361_s10, %s357_s9 }
   0x5   : > { %p48_p2 = scmp.eq.s32.totalorder %s365_s11, 0  ;;  %p306_p4 = scmp.ge.s32.totalorder %s365_s11, 2 }
   0x6   : > { %s408_s16 = scalar_select %p38_p0, %s361_s10, %s40_s15  }
   0x7   : > { %p49_p3 = por %p48_p2, %p47_p1  ;;  %102 = sbr.rel (%p306_p4) target bundleno = 26 (0x1a), region = 20 }
   0xc   : > { %105 = sbr.rel (!%p49_p3) target bundleno = 26 (0x1a), region = 24  ;;  %s107_s17 = sand.u32 (%p49_p3), 1, %s361_s10  }
   0xd   : > { %s316_s18 = sshll.u32 (%p49_p3), %s365_s11, 4  ;;  %s317_s19 = smul.u32 (%p49_p3), 80, %s107_s17 }
   0xe   : > { %s112_s22 = scalar_lea.vmem (%p49_p3), %s438_s1, %s316_s18 }
   0xf   : > { %v125_v0 = vld [vmem:[%s112_s22] sm:$0xff] (%p49_p3)  ;;  %v127_v1 = vld [vmem:[%s112_s22 + $0x8] sm:$0xff] (%p49_p3)  ;;  %s109_s23 = scalar_lea.vmem (%p49_p3), [#allocation2], %s317_s19 }
  0x10   : > { %v129_v2 = vld [vmem:[%s112_s22 + $0x20] sm:$0xff] (%p49_p3)  ;;  %126 = vst [vmem:[%s109_s23] sm:$0xff] (%p49_p3), %v125_v0  ;;  %v131_v3 = vld [vmem:[%s112_s22 + $0x28] sm:$0xff] (%p49_p3) }
  0x11   : > { %128 = vst [vmem:[%s109_s23 + $0x8] sm:$0xff] %v127_v1  ;;  %v133_v4 = vld [vmem:[%s112_s22 + $0x40] sm:$0xff]  ;;  %v135_v5 = vld [vmem:[%s112_s22 + $0x48] sm:$0xff] }
  0x12   : > { %130 = vst [vmem:[%s109_s23 + $0x10] sm:$0xff] %v129_v2  ;;  %v137_v6 = vld [vmem:[%s112_s22 + $0x60] sm:$0xff]  ;;  %v139_v7 = vld [vmem:[%s112_s22 + $0x68] sm:$0xff] }
  0x13   : > { %132 = vst [vmem:[%s109_s23 + $0x18] sm:$0xff] %v131_v3  ;;  %v141_v8 = vld [vmem:[%s112_s22 + $0x80] sm:$0xff]  ;;  %v143_v9 = vld [vmem:[%s112_s22 + $0x88] sm:$0xff] }
  0x14   : > { %134 = vst [vmem:[%s109_s23 + $0x20] sm:$0xff] %v133_v4 }
  0x15   : > { %136 = vst [vmem:[%s109_s23 + $0x28] sm:$0xff] %v135_v5 }
  0x16   : > { %138 = vst [vmem:[%s109_s23 + $0x30] sm:$0xff] %v137_v6 }
  0x17   : > { %140 = vst [vmem:[%s109_s23 + $0x38] sm:$0xff] %v139_v7 }
  0x18   : > { %142 = vst [vmem:[%s109_s23 + $0x40] sm:$0xff] %v141_v8 }
  0x19   : > { %144 = vst [vmem:[%s109_s23 + $0x48] sm:$0xff] %v143_v9 }
  0x1a PF: > { %p309_p5 = scmp.ge.s32.totalorder %s365_s11, 1  ;;  %p149_p6 = scmp.lt.s32.totalorder %s365_s11, 3 }
  0x1c   : > { %p150_p7 = pnand %p309_p5, %p149_p6 }
  0x1d   : > { %s156_s24 = sand.u32 (!%p150_p7), 1, %s357_s9   ;;  %s310_s29 = sshll.u32 (!%p150_p7), %s303_s12, 1 }
  0x1e   : > { %153 = sbr.rel (%p150_p7) target bundleno = 173 (0xad), region = 47  ;;  %p179_p8 = scmp.lt.s32.totalorder (!%p150_p7), %s310_s29, 3 }
  0x1f   : > { %s318_s25 = smul.u32 (!%p150_p7), 80, %s156_s24 }
  0x21   : > { %s158_s26 = scalar_lea.vmem (!%p150_p7), [#allocation2], %s318_s25 }
  0x23   : > { %v193_v10 = vld [vmem:[%s158_s26 + $0x40] sm:$0xff]  ;;  %v194_v11 = vld [vmem:[%s158_s26 + $0x48] sm:$0xff]  ;;  %v191_v12 = vld [vmem:[%s158_s26 + $0x30] sm:$0xff]  ;;  %vm195_vm0 = vcmask 326656   ;;  %s444_s29 = smov (!%p179_p8, %s310_s29), 3 }
  0x24   : > { %210 = vmatpush.msra.mxu0 %v193_v10  ;;  %230 = vmatpush.msra.mxu1 %v194_v11  ;;  %v192_v13 = vld [vmem:[%s158_s26 + $0x38] sm:$0xff]  ;;  %v189_v14 = vld [vmem:[%s158_s26 + $0x20] sm:$0xff]  ;;  %v190_v15 = vld [vmem:[%s158_s26 + $0x28] sm:$0xff]  ;;  %s311_s30 = sshll.u32 %s444_s29, 3 }
  0x25   : > { %v187_v16 = vld [vmem:[%s158_s26 + $0x10] sm:$0xff]  ;;  %v188_v17 = vld [vmem:[%s158_s26 + $0x18] sm:$0xff]  ;;  %v185_v18 = vld [vmem:[%s158_s26] sm:$0xff]  ;;  %s182_s5 = scalar_lea.vmem %s439_s2, %s311_s30 }
  0x26   : > { %211 = vmatpush.msra.mxu0 %v191_v12  ;;  %231 = vmatpush.msra.mxu1 %v192_v13  ;;  %v186_v19 = vld [vmem:[%s158_s26 + $0x8] sm:$0xff]  ;;  %v184_v20 = vld [vmem:[%s437_s0] sm:$0xff] }
  0x28   : > { %212 = vmatpush.msra.mxu0 %v189_v14  ;;  %232 = vmatpush.msra.mxu1 %v190_v15 }
  0x2a   : > { %213 = vmatpush.msra.mxu0 %v187_v16  ;;  %233 = vmatpush.msra.mxu1 %v188_v17 }
  0x2c   : > { %214 = vmatpush.msra.mxu0 %v185_v18  ;;  %234 = vmatpush.msra.mxu1 %v186_v19 }
  0x2d   : > { %312 = vmatmul.msk.f32.vlgmr.msra.gmra.mxu0 %vm195_vm0, %v184_v20  ;;  %313 = vmatmul.msk.f32.vlgmr.msra.gmra.mxu1 %vm195_vm0, %v184_v20 }
  0xaa   : > { %v216_v21 = vpop.f32.mrf.mxu0  ;;  %v236_v22 = vpop.f32.mrf.mxu1 }
  0xab   : > { %239 = vst [vmem:[%s182_s5] sm:$0xff] %v216_v21 }
  0xac   : > { %240 = vst [vmem:[%s182_s5 + $0x8] sm:$0xff] %v236_v22 }
  0xad PF: > { %p9_p9 = scmp.ge.s32.totalorder %s399_s13, 4   ;;  %s440_s9 = smov %s361_s10 }
  0xae   : > { %s441_s10 = smov %s408_s16  ;;  %s442_s11 = smov %s399_s13 }
  0xaf   :  { %11 = sbr.rel (!%p9_p9) target bundleno = 2 (0x2), region = 86 }

</bundles_post_ra>
